<compile_context>
chip_gen: v5e
topology: v5e:2x2
jax: 0.10.0
libtpu: 0.0.40
codegen_flags: <defaults>
</compile_context>

<pallas_src>
import jax
import jax.numpy as jnp
from jax.experimental import pallas as pl
from jax.experimental.pallas import tpu as pltpu


def _dma_flatten_kernel(x_hbm_ref, o_hbm_ref, copy_sem):
    # One descriptor: whole-array HBM -> HBM copy.  No VMEM staging, no
    # per-tile overhead; bandwidth-bound at the HBM roofline.
    cp = pltpu.make_async_copy(x_hbm_ref, o_hbm_ref, copy_sem)
    cp.start()
    cp.wait()


def flatten(x, *, materialize=True):
    """Pallas equivalent of the PyTorch Flatten module forward.

    Semantics: x.view(-1, prod(x.shape[1:])) on a contiguous tensor, i.e. a
    row-major reshape to (N, C*H*W).

    materialize=False returns the metadata-only reshape (the truly optimal
    "kernel" -- zero HBM traffic).  materialize=True (default) runs the Pallas
    HBM->HBM DMA kernel to produce a fresh buffer, matching the requested
    module-as-kernel form.
    """
    n = x.shape[0]
    flat = 1
    for d in x.shape[1:]:
        flat *= d

    # Free metadata reshape on contiguous data; done wrapper-side so the
    # kernel sees two identically shaped 2-D slabs.
    x2 = jnp.reshape(x, (n, flat))

    if not materialize:
        return x2

    return pl.pallas_call(
        _dma_flatten_kernel,
        out_shape=jax.ShapeDtypeStruct((n, flat), x.dtype),
        in_specs=[pl.BlockSpec(memory_space=pl.ANY)],   # raw HBM ref, no auto-DMA
        out_specs=pl.BlockSpec(memory_space=pl.ANY),    # raw HBM ref, no auto-DMA
        scratch_shapes=[pltpu.SemaphoreType.DMA(())],
    )(x2)


if __name__ == "__main__":
    key = jax.random.PRNGKey(0)
    # Small shape consistent with the module's usage (flatten of a conv feature map).
    x = jax.random.normal(key, (2, 4, 16, 16), dtype=jnp.float32)

    out = flatten(x)                       # Pallas DMA kernel path
    out = jax.block_until_ready(out)

    # Reference: torch .view(-1, prod) on contiguous NCHW == row-major reshape.
    ref = x.reshape(x.shape[0], -1)
    assert out.shape == (2, 4 * 16 * 16), out.shape
    assert jnp.array_equal(out, ref), "Pallas flatten mismatch vs reference reshape"

    # The metadata-only path must agree as well (and is the preferred form
    # when the caller does not need a materialized copy).
    assert jnp.array_equal(flatten(x, materialize=False), ref)

    print("KERNEL_OK")
</pallas_src>

<mosaic_0001>
module attributes {stable_mosaic.version = 11 : i64} {
  func.func @_dma_flatten_kernel(%arg0: memref<2x1024xf32, #tpu.memory_space<any>>, %arg1: memref<2x1024xf32, #tpu.memory_space<any>>, %arg2: memref<!tpu.dma_semaphore, #tpu.memory_space<semaphore_mem>>) attributes {dimension_semantics = [], scalar_prefetch = 0 : i64, scratch_operands = 1 : i64, tpu.core_type = #tpu.core_type<tc>} {
    tpu.enqueue_dma source(%arg0 : memref<2x1024xf32, #tpu.memory_space<any>>) target(%arg1 : memref<2x1024xf32, #tpu.memory_space<any>>) target_semaphore(%arg2 : memref<!tpu.dma_semaphore, #tpu.memory_space<semaphore_mem>>)
    tpu.wait_dma2 semaphore(%arg2 : memref<!tpu.dma_semaphore, #tpu.memory_space<semaphore_mem>>) src(%arg0 : memref<2x1024xf32, #tpu.memory_space<any>>) dst(%arg1 : memref<2x1024xf32, #tpu.memory_space<any>>)
    return
  }
}

</mosaic_0001>

<bundles_post_ra>
// kernel: tpu_custom_call.1
= control target key start
LH: loop header
LB: loop body
LE: loop exit
PB: predicated region body
PF: predicated region fallthrough
CT: control target
= control target key end

     0   :  { %s33_s12 = smov [#allocation2]   ;;  %s34_s13 = smov [#allocation3]   ;;  %s52_s0 = inlined_call_operand.hbm [shape: f32[2,1024], index: 0, kind: input, shape index: {}]   ;;  %s53_s1 = inlined_call_operand.hbm [shape: f32[2,1024], index: 1, kind: output, shape index: {}]  }
   0x1   :  { %s10_s8 = sshll.u32 %s52_s0, 4  ;;  %s12_s11 = sshll.u32 %s53_s1, 4  ;;  %s11_s8 = int_to_ptr.hbm [resolvable:$true] %s10_s8  ;;  %s13_s11 = int_to_ptr.hbm [resolvable:$true] %s12_s11 }
   0x2   :  { %s35_s14 = smov 0  }
   0x3   :  { %16 = dma.general %s11_s8, 256, %s13_s11, %s33_s12, %s34_s13, [#allocation4], %s35_s14, 0  }
   0x4   :  { %31 = dma.done.wait [#allocation2], 256 }
   0x5   :  { %32 = vsyncadd [#allocation2], 4294967040 }
   0x6   :  { %21 = vsyncmov [#allocation2] }
   0x9   :  { %s22_s15 = vpop.sfrf %21 }
   0xa   :  { %p27_p0 = scmp.ne.s32.totalorder %s22_s15, 0 }
   0xc   :  { %26 = shalt.err (%p27_p0)  }

</bundles_post_ra>
